<compile_context>
chip_gen: v5e
topology: v5e:2x2
jax: 0.10.0
libtpu: 0.0.40
codegen_flags: <defaults>
</compile_context>

<pallas_src>
import jax
import jax.numpy as jnp
from jax.experimental import pallas as pl
from jax.experimental.pallas import tpu as pltpu

_LANES = 128  # vreg lane width


def _logreg_kernel(w_ref, b_ref, x_ref, o_ref):
    # w_ref, b_ref: (1,) f32 in SMEM (scalar path).
    # x_ref, o_ref: (tile_rows, 128) f32 in VMEM (lane-dense).
    # sigmoid(z) = 0.5 * tanh(z / 2) + 0.5  -> one EUP op per element.
    wh = w_ref[0] * 0.5                        # scalar ops, free
    bh = b_ref[0] * 0.5
    z_half = x_ref[...] * wh + bh              # VPU FMA, no MXU
    o_ref[...] = jnp.tanh(z_half) * 0.5 + 0.5  # tanh on EUP, mul/add on VPU


def logistic_regression(x, weight, bias, *, tile_rows=2048):
    """y = sigmoid(x @ weight.T + bias).  x: (N, 1) f32 -> (N, 1) f32."""
    n, f = x.shape
    assert f == 1 and weight.shape == (1, 1) and bias.shape == (1,)

    # Lane-dense view: flatten the batch onto (rows, 128).  Metadata-only
    # when N % 128 == 0; otherwise pad only to the next multiple of 128
    # (NOT up to a whole tile) and let Pallas mask the ragged last block.
    rows = pl.cdiv(n, _LANES)
    padded = rows * _LANES
    flat = x.reshape(-1)
    if padded != n:
        flat = jnp.pad(flat, (0, padded - n))
    x2d = flat.reshape(rows, _LANES)

    # Tile selection: enforce multiple-of-8 sublane dim on user-supplied
    # values; small inputs use one full-array block (block == full dims is
    # always legal); larger inputs get >= 2 grid steps automatically.
    tile_rows = max(8, (int(tile_rows) // 8) * 8)
    if rows <= tile_rows:
        tile_rows = rows
    num_blocks = pl.cdiv(rows, tile_rows)

    out2d = pl.pallas_call(
        _logreg_kernel,
        out_shape=jax.ShapeDtypeStruct((rows, _LANES), jnp.float32),
        grid=(num_blocks,),
        in_specs=[
            pl.BlockSpec(memory_space=pltpu.MemorySpace.SMEM),    # weight (1,)
            pl.BlockSpec(memory_space=pltpu.MemorySpace.SMEM),    # bias   (1,)
            pl.BlockSpec((tile_rows, _LANES), lambda i: (i, 0)),  # x tile
        ],
        out_specs=pl.BlockSpec((tile_rows, _LANES), lambda i: (i, 0)),
        compiler_params=pltpu.CompilerParams(
            dimension_semantics=("parallel",),
        ),
    )(weight.reshape(1), bias.reshape(1), x2d)

    out = out2d.reshape(-1)
    if padded != n:
        out = out[:n]
    return out.reshape(n, 1)


if __name__ == "__main__":
    key = jax.random.PRNGKey(0)

    # Deterministic parameters (nn.Linear(1, 1): weight (1, 1), bias (1,)).
    weight = jnp.array([[0.75]], dtype=jnp.float32)
    bias = jnp.array([-0.25], dtype=jnp.float32)

    # 1) Small batch, same shape the PyTorch module expects: (N, 1).
    N = 8
    x = jax.random.normal(key, (N, 1), dtype=jnp.float32)
    out = jax.block_until_ready(logistic_regression(x, weight, bias))
    ref = jax.nn.sigmoid(x @ weight.T + bias)
    assert out.shape == (N, 1)
    assert jnp.allclose(out, ref, atol=1e-4), "small-batch mismatch"

    # 2) 128-aligned batch: no padding, multi-step parallel grid (2 blocks).
    N2 = 4096 * 128
    x2 = jax.random.normal(jax.random.PRNGKey(1), (N2, 1), dtype=jnp.float32)
    out2 = jax.block_until_ready(logistic_regression(x2, weight, bias))
    ref2 = jax.nn.sigmoid(x2 @ weight.T + bias)
    assert out2.shape == (N2, 1)
    assert jnp.allclose(out2, ref2, atol=1e-4), "aligned-batch mismatch"

    # 3) Ragged batch + non-multiple-of-8 user tile (clamped to 96): exercises
    #    the 128-pad tail and the masked ragged last row-block.
    N3 = 300000
    x3 = jax.random.normal(jax.random.PRNGKey(2), (N3, 1), dtype=jnp.float32)
    out3 = jax.block_until_ready(
        logistic_regression(x3, weight, bias, tile_rows=100))
    ref3 = jax.nn.sigmoid(x3 @ weight.T + bias)
    assert out3.shape == (N3, 1)
    assert jnp.allclose(out3, ref3, atol=1e-4), "ragged-batch mismatch"

    print("KERNEL_OK")
</pallas_src>

<mosaic_0001>
module attributes {stable_mosaic.version = 11 : i64} {
  func.func @_logreg_kernel(%arg0: i32, %arg1: memref<1xf32, #tpu.memory_space<smem>>, %arg2: memref<1xf32, #tpu.memory_space<smem>>, %arg3: memref<1x128xf32, #tpu.memory_space<vmem>>, %arg4: memref<1x128xf32, #tpu.memory_space<vmem>>) attributes {dimension_semantics = [#tpu.dimension_semantics<parallel>], iteration_bounds = array<i64: 1>, scalar_prefetch = 0 : i64, scratch_operands = 0 : i64, tpu.core_type = #tpu.core_type<tc>, window_params = [{transform_indices = @transform_0, window_bounds = array<i64: 1>}, {transform_indices = @transform_1, window_bounds = array<i64: 1>}, {transform_indices = @transform_2, window_bounds = array<i64: 1, 128>}, {transform_indices = @transform_3, window_bounds = array<i64: 1, 128>}]} {
    %c0 = arith.constant 0 : index
    %0 = memref.load %arg1[%c0] : memref<1xf32, #tpu.memory_space<smem>>
    %cst = arith.constant 5.000000e-01 : f32
    %1 = arith.mulf %0, %cst : f32
    %c0_0 = arith.constant 0 : index
    %2 = memref.load %arg2[%c0_0] : memref<1xf32, #tpu.memory_space<smem>>
    %cst_1 = arith.constant 5.000000e-01 : f32
    %3 = arith.mulf %2, %cst_1 : f32
    %c0_2 = arith.constant 0 : index
    %c0_3 = arith.constant 0 : index
    %4 = vector.load %arg3[%c0_2, %c0_3] : memref<1x128xf32, #tpu.memory_space<vmem>>, vector<1x128xf32>
    %5 = vector.broadcast %1 : f32 to vector<1x128xf32>
    %6 = arith.mulf %4, %5 : vector<1x128xf32>
    %7 = vector.broadcast %3 : f32 to vector<1x128xf32>
    %8 = arith.addf %6, %7 : vector<1x128xf32>
    %9 = math.tanh %8 : vector<1x128xf32>
    %cst_4 = arith.constant 5.000000e-01 : f32
    %10 = vector.broadcast %cst_4 : f32 to vector<1x128xf32>
    %11 = arith.mulf %9, %10 : vector<1x128xf32>
    %cst_5 = arith.constant 5.000000e-01 : f32
    %12 = vector.broadcast %cst_5 : f32 to vector<1x128xf32>
    %13 = arith.addf %11, %12 : vector<1x128xf32>
    %c0_6 = arith.constant 0 : index
    %c0_7 = arith.constant 0 : index
    %14 = vector.load %arg4[%c0_6, %c0_7] : memref<1x128xf32, #tpu.memory_space<vmem>>, vector<1x128xf32>
    tpu.vector_store %arg4[%c0_6, %c0_7], %13 {strides = array<i32>} : memref<1x128xf32, #tpu.memory_space<vmem>>, vector<1x128xf32>,
    return
  }
  func.func @transform_0(%arg0: i32) -> i32 {
    %c0_i32 = arith.constant 0 : i32
    %c0_i32_0 = arith.constant 0 : i32
    return %c0_i32 : i32
  }
  func.func @transform_1(%arg0: i32) -> i32 {
    %c0_i32 = arith.constant 0 : i32
    %c0_i32_0 = arith.constant 0 : i32
    return %c0_i32 : i32
  }
  func.func @transform_2(%arg0: i32) -> (i32, i32) {
    %c0_i32 = arith.constant 0 : i32
    %c0_i32_0 = arith.constant 0 : i32
    return %arg0, %c0_i32 : i32, i32
  }
  func.func @transform_3(%arg0: i32) -> (i32, i32) {
    %c0_i32 = arith.constant 0 : i32
    %c0_i32_0 = arith.constant 0 : i32
    return %arg0, %c0_i32 : i32, i32
  }
}

</mosaic_0001>

<bundles_post_ra>
// kernel: tpu_custom_call.1
= control target key start
LH: loop header
LB: loop body
LE: loop exit
PB: predicated region body
PF: predicated region fallthrough
CT: control target
= control target key end

     0   :  { %s108_s0 = inlined_call_operand.<no memory space> [shape: f32[1], index: 0, kind: input, shape index: {}]   ;;  %s109_s1 = inlined_call_operand.<no memory space> [shape: f32[1], index: 1, kind: input, shape index: {}]   ;;  %s110_s2 = inlined_call_operand.vmem [shape: f32[1,128], index: 2, kind: input, shape index: {}]   ;;  %s111_s3 = inlined_call_operand.hbm [shape: f32[1,128], index: 3, kind: output, shape index: {}]  }
   0x1   :  { %s18_s14 = smul.f32 0.5, %s108_s0  ;;  %v21_v0 = vld [vmem:[%s110_s2] sm:$0x1] }
   0x2   :  { %10 = vsyncpa [#allocation5], 0  ;;  %s20_s19 = smul.f32 0.5, %s109_s1  ;;  %s75_s20 = smov [#allocation4]  }
   0x3   :  { %v22_v1 = vstv %s18_s14  ;;  %s35_s21 = sshll.u32 %s75_s20, 4  ;;  %s37_s0 = sshll.u32 %s111_s3, 4  ;;  %s36_s21 = int_to_ptr.vmem [resolvable:$true] %s35_s21  ;;  %s38_s0 = int_to_ptr.hbm [resolvable:$true] %s37_s0 }
   0x4   :  { %v23_v2 = vmul.f32 %v22_v1, %v21_v0  ;;  %v24_v3 = vstv %s20_s19 }
   0x6   :  { %v25_v4 = vadd.f32 %v24_v3, %v23_v2 }
   0x8   :  { %47 = vtanh.f32 %v25_v4 }
   0xe   :  { %v48_v5 = vpop.eup %47 }
   0xf   :  { %v27_v6 = vmul.f32 0.5, %v48_v5 }
  0x11   :  { %v28_v7 = vadd.f32 0.5, %v27_v6 }
  0x13   :  { %29 = vst [vmem:[#allocation4] sm:$0x1] %v28_v7 }
  0x14   :  { %40 = dma.vmem_to_hbm [thread:$0]  %s36_s21, 16, %s38_s0, [#allocation5]  }
  0x15   :  { %73 = dma.done.wait [#allocation5], 16  }
  0x16   :  { %74 = vsyncadd [#allocation5], 4294967280 }
  0x17   :  { %45 = vsyncpa [#allocation5], 1 }

</bundles_post_ra>
